<compile_context>
chip_gen: v6e
topology: v6e:2x2x1
jax: 0.10.0
libtpu: 0.0.40
codegen_flags: <defaults>
</compile_context>

<pallas_src>
import jax
import jax.numpy as jnp
from jax.experimental import pallas as pl
from jax.experimental.pallas import tpu as pltpu


def _interp_matrix(n_in, n_out):
    """(n_out, n_in) 1-D bilinear interpolation matrix, align_corners=True."""
    denom = max(n_out - 1, 1)
    src = jnp.arange(n_out, dtype=jnp.float32) * (float(n_in - 1) / float(denom))
    lo = jnp.clip(jnp.floor(src).astype(jnp.int32), 0, n_in - 1)
    hi = jnp.minimum(lo + 1, n_in - 1)
    w = src - lo.astype(jnp.float32)
    rows = jnp.arange(n_out)
    m = jnp.zeros((n_out, n_in), jnp.float32)
    m = m.at[rows, lo].add(1.0 - w)
    m = m.at[rows, hi].add(w)
    return m


def _upsample_conv_kernel(x_ref, k_ref, w_ref, b_ref, o_ref):
    # x_ref: (Cin, H*W)      input planes for this batch element (spatial flattened, lane-dense)
    # k_ref: (H*W, Ho*Wo)    dense separable bilinear upsample operator, kron(Ah, Aw)^T
    # w_ref: (Ct, Cin)       1x1-conv weights for this Cout tile
    # b_ref: (Ct, 1)         bias for this Cout tile (broadcast over lanes)
    # o_ref: (Ct, Ho*Wo)     output tile, last dim a large multiple of 128
    #
    # 1x1 conv FIRST (channel mix at low resolution) -- MXU matmul, f32 accumulation.
    y = jnp.dot(w_ref[...], x_ref[...], preferred_element_type=jnp.float32)      # (Ct, H*W)
    # Bilinear upsample of all Ct planes at once -- one MXU matmul, lane-dense output.
    up = jnp.dot(y, k_ref[...], preferred_element_type=jnp.float32)              # (Ct, Ho*Wo)
    o_ref[...] = (up + b_ref[...]).astype(o_ref.dtype)


def upsample_conv(x_nchw, weight, bias, scale=(2, 2)):
    """Equivalent of UpsampleConv(in, out)(x): bilinear upsample (align_corners=True)
    followed by a 1x1 conv with bias.  x_nchw: (B, Cin, H, W); weight: (Cout, Cin, 1, 1)."""
    B, Cin, H, W = x_nchw.shape
    Cout = weight.shape[0]
    Ho, Wo = int(H * scale[0]), int(W * scale[1])
    HW, HoWo = H * W, Ho * Wo

    ah = _interp_matrix(H, Ho)                              # (Ho, H)
    aw = _interp_matrix(W, Wo)                              # (Wo, W)
    # Dense separable operator: K[h*W+w, ho*Wo+wo] = Ah[ho, h] * Aw[wo, w].
    k_mat = jnp.kron(ah, aw).T                              # (H*W, Ho*Wo), f32

    x_flat = x_nchw.reshape(B, Cin, HW)                     # free row-major reshape
    w_mat = weight.reshape(Cout, Cin).astype(jnp.float32)   # 2-D weights, no padded scalars
    b_col = bias.reshape(Cout, 1).astype(jnp.float32)

    itemsize = jnp.dtype(x_nchw.dtype).itemsize

    def _pad2(r, c, isz):
        """Bytes of an (r, c) block padded to the (8, 128) vreg tile."""
        return ((r + 7) // 8 * 8) * ((c + 127) // 128 * 128) * isz

    # Per-step VMEM independent of the Cout tile (double-buffered by the pipeline).
    fixed_bytes = 2 * _pad2(Cin, HW, itemsize) + 2 * _pad2(HW, HoWo, 4)

    def _tile_bytes(ct):
        return (2 * _pad2(ct, Cin, 4)          # weight tile
                + 2 * _pad2(ct, 1, 4)          # bias tile
                + 2 * _pad2(ct, HoWo, itemsize))  # output tile

    budget = 40 * 1024 * 1024   # headroom under v7x's 64 MiB physical VMEM

    # Cout tile: largest divisor of Cout (full, or a multiple of 8) whose blocks fit VMEM.
    candidates = [Cout] + [d for d in range(8 * (Cout // 8), 7, -8)
                           if d < Cout and Cout % d == 0]
    cout_tile = None
    for ct in candidates:
        if fixed_bytes + _tile_bytes(ct) <= budget:
            cout_tile = ct
            break
    if cout_tile is None:
        raise ValueError(
            "UpsampleConv Pallas kernel: per-step blocks exceed the VMEM budget; "
            "the large-spatial (Ho-tiled separable) path is not implemented yet.")

    # Keep both v7x TensorCores busy when the batch alone cannot (neutral on v5e/v6e).
    if B < 2 and cout_tile == Cout and Cout % 16 == 0:
        cout_tile = Cout // 2
    n_ct = Cout // cout_tile

    total_bytes = fixed_bytes + _tile_bytes(cout_tile)
    vmem_limit = int(min(48 * 1024 * 1024, max(8 * 1024 * 1024, 2 * total_bytes)))

    out_flat = pl.pallas_call(
        _upsample_conv_kernel,
        out_shape=jax.ShapeDtypeStruct((B, Cout, HoWo), x_nchw.dtype),
        grid_spec=pltpu.PrefetchScalarGridSpec(
            num_scalar_prefetch=0,
            grid=(B, n_ct),                         # fully parallel, no reduction axis
            in_specs=[
                pl.BlockSpec((None, Cin, HW), lambda b, j: (b, 0, 0)),   # x planes
                pl.BlockSpec((HW, HoWo), lambda b, j: (0, 0)),           # K (grid-invariant)
                pl.BlockSpec((cout_tile, Cin), lambda b, j: (j, 0)),     # weight tile
                pl.BlockSpec((cout_tile, 1), lambda b, j: (j, 0)),       # bias tile
            ],
            out_specs=pl.BlockSpec((None, cout_tile, HoWo), lambda b, j: (b, j, 0)),
        ),
        compiler_params=pltpu.CompilerParams(
            dimension_semantics=("parallel", "parallel"),
            vmem_limit_bytes=vmem_limit,
        ),
    )(x_flat, k_mat, w_mat, b_col)

    return out_flat.reshape(B, Cout, Ho, Wo)        # free reshape back to NCHW


def _reference(x, weight, bias, scale=(2, 2)):
    """Pure-JAX reference of the PyTorch forward (bilinear align_corners=True + 1x1 conv)."""
    B, Cin, H, W = x.shape
    Cout = weight.shape[0]
    Ho, Wo = int(H * scale[0]), int(W * scale[1])
    ah = _interp_matrix(H, Ho)
    aw = _interp_matrix(W, Wo)
    up = jnp.einsum("ih,jw,bchw->bcij", ah, aw, x.astype(jnp.float32))
    wm = weight.reshape(Cout, Cin).astype(jnp.float32)
    out = jnp.einsum("kc,bcij->bkij", wm, up) + bias.astype(jnp.float32)[None, :, None, None]
    return out.astype(x.dtype)


if __name__ == "__main__":
    key = jax.random.PRNGKey(0)
    kx, kw, kb = jax.random.split(key, 3)

    B, Cin, Cout, H, W = 2, 4, 8, 16, 16
    scale = (2, 2)

    x = jax.random.normal(kx, (B, Cin, H, W), dtype=jnp.float32)
    weight = jax.random.normal(kw, (Cout, Cin, 1, 1), dtype=jnp.float32) * (1.0 / Cin ** 0.5)
    bias = jax.random.normal(kb, (Cout,), dtype=jnp.float32) * 0.1

    out = upsample_conv(x, weight, bias, scale=scale)
    out = jax.block_until_ready(out)

    ref = _reference(x, weight, bias, scale=scale)
    assert out.shape == (B, Cout, H * scale[0], W * scale[1]), out.shape
    assert jnp.allclose(out, ref, atol=1e-4, rtol=1e-4), float(jnp.max(jnp.abs(out - ref)))

    print("KERNEL_OK")
</pallas_src>

<mosaic_0001>
module attributes {stable_mosaic.version = 11 : i64} {
  func.func @_upsample_conv_kernel(%arg0: i32, %arg1: i32, %arg2: memref<1x4x256xf32, #tpu.memory_space<vmem>>, %arg3: memref<256x1024xf32, #tpu.memory_space<vmem>>, %arg4: memref<8x4xf32, #tpu.memory_space<vmem>>, %arg5: memref<8x1xf32, #tpu.memory_space<vmem>>, %arg6: memref<1x8x1024xf32, #tpu.memory_space<vmem>>) attributes {dimension_semantics = [#tpu.dimension_semantics<parallel>, #tpu.dimension_semantics<parallel>], iteration_bounds = array<i64: 2, 1>, scalar_prefetch = 0 : i64, scratch_operands = 0 : i64, tpu.core_type = #tpu.core_type<tc>, window_params = [{transform_indices = @transform_0, window_bounds = array<i64: 1, 4, 256>}, {pipeline_mode = #tpu.pipeline_mode<synchronous>, transform_indices = @transform_1, window_bounds = array<i64: 256, 1024>}, {transform_indices = @transform_2, window_bounds = array<i64: 8, 4>}, {transform_indices = @transform_3, window_bounds = array<i64: 8, 1>}, {transform_indices = @transform_4, window_bounds = array<i64: 1, 8, 1024>}]} {
    %c0 = arith.constant 0 : index
    %c0_0 = arith.constant 0 : index
    %0 = vector.load %arg4[%c0, %c0_0] : memref<8x4xf32, #tpu.memory_space<vmem>>, vector<8x4xf32>
    %c0_1 = arith.constant 0 : index
    %c0_2 = arith.constant 0 : index
    %c0_3 = arith.constant 0 : index
    %1 = vector.load %arg2[%c0_1, %c0_2, %c0_3] : memref<1x4x256xf32, #tpu.memory_space<vmem>>, vector<1x4x256xf32>
    %2 = vector.shape_cast %1 : vector<1x4x256xf32> to vector<4x256xf32>
    %cst = arith.constant dense<0.000000e+00> : vector<8x256xf32>
    %3 = tpu.matmul %0, %2, %cst {dimension_numbers = #tpu.dot_dimension_numbers<[1], [0], [0], [1], [0, 0, 1, 1], [], []>} : vector<8x4xf32>, vector<4x256xf32>, vector<8x256xf32> -> vector<8x256xf32>
    %c0_4 = arith.constant 0 : index
    %c0_5 = arith.constant 0 : index
    %4 = vector.load %arg3[%c0_4, %c0_5] : memref<256x1024xf32, #tpu.memory_space<vmem>>, vector<256x1024xf32>
    %cst_6 = arith.constant dense<0.000000e+00> : vector<8x1024xf32>
    %5 = tpu.matmul %3, %4, %cst_6 {dimension_numbers = #tpu.dot_dimension_numbers<[1], [0], [0], [1], [0, 0, 1, 1], [], []>} : vector<8x256xf32>, vector<256x1024xf32>, vector<8x1024xf32> -> vector<8x1024xf32>
    %c0_7 = arith.constant 0 : index
    %c0_8 = arith.constant 0 : index
    %6 = vector.load %arg5[%c0_7, %c0_8] : memref<8x1xf32, #tpu.memory_space<vmem>>, vector<8x1xf32>
    %7 = vector.broadcast %6 : vector<8x1xf32> to vector<8x1024xf32>
    %8 = arith.addf %5, %7 : vector<8x1024xf32>
    %c0_9 = arith.constant 0 : index
    %c0_10 = arith.constant 0 : index
    %c0_11 = arith.constant 0 : index
    %9 = vector.load %arg6[%c0_9, %c0_10, %c0_11] : memref<1x8x1024xf32, #tpu.memory_space<vmem>>, vector<1x8x1024xf32>
    %10 = vector.shape_cast %9 : vector<1x8x1024xf32> to vector<8x1024xf32>
    %11 = vector.shape_cast %8 : vector<8x1024xf32> to vector<1x8x1024xf32>
    tpu.vector_store %arg6[%c0_9, %c0_10, %c0_11], %11 {strides = array<i32>} : memref<1x8x1024xf32, #tpu.memory_space<vmem>>, vector<1x8x1024xf32>,
    return
  }
  func.func @transform_0(%arg0: i32, %arg1: i32) -> (i32, i32, i32) {
    %c0_i32 = arith.constant 0 : i32
    %c0_i32_0 = arith.constant 0 : i32
    %c0_i32_1 = arith.constant 0 : i32
    return %arg0, %c0_i32, %c0_i32_0 : i32, i32, i32
  }
  func.func @transform_1(%arg0: i32, %arg1: i32) -> (i32, i32) {
    %c0_i32 = arith.constant 0 : i32
    %c0_i32_0 = arith.constant 0 : i32
    %c0_i32_1 = arith.constant 0 : i32
    return %c0_i32, %c0_i32_0 : i32, i32
  }
  func.func @transform_2(%arg0: i32, %arg1: i32) -> (i32, i32) {
    %c0_i32 = arith.constant 0 : i32
    %c0_i32_0 = arith.constant 0 : i32
    return %arg1, %c0_i32 : i32, i32
  }
  func.func @transform_3(%arg0: i32, %arg1: i32) -> (i32, i32) {
    %c0_i32 = arith.constant 0 : i32
    %c0_i32_0 = arith.constant 0 : i32
    return %arg1, %c0_i32 : i32, i32
  }
  func.func @transform_4(%arg0: i32, %arg1: i32) -> (i32, i32, i32) {
    %c0_i32 = arith.constant 0 : i32
    %c0_i32_0 = arith.constant 0 : i32
    return %arg0, %arg1, %c0_i32 : i32, i32, i32
  }
}

</mosaic_0001>

<bundles_post_ra>
// kernel: tpu_custom_call.1
= control target key start
LH: loop header
LB: loop body
LE: loop exit
PB: predicated region body
PF: predicated region fallthrough
CT: control target
= control target key end

     0   :  { %9 = vsyncpa [#allocation3], 0  ;;  %s1401_s0 = inlined_call_operand.vmem [shape: f32[2,4,256], index: 0, kind: input, shape index: {}]   ;;  %s1402_s1 = inlined_call_operand.hbm [shape: f32[256,1024], index: 1, kind: input, shape index: {}]   ;;  %s1403_s2 = inlined_call_operand.vmem [shape: f32[8,4], index: 2, kind: input, shape index: {}]   ;;  %s1404_s3 = inlined_call_operand.vmem [shape: f32[8,1], index: 3, kind: input, shape index: {}]   ;;  %s1405_s4 = inlined_call_operand.hbm [shape: f32[2,8,1024], index: 4, kind: output, shape index: {}]  }
   0x1   :  { %10 = vsyncpa [#allocation4], 0 }
   0x2   :  { %12 = vsyncpa [#allocation4 + $0x1], 0  ;;  %s1259_s15 = smov 0   ;;  %s1261_s16 = smov 0  }
   0x3   :  { %s1263_s17 = smov 0   ;;  %s1265_s18 = smov 0  }
   0x4   :  { %s1267_s19 = smov 0   ;;  %s1269_s20 = smov 0  }
   0x5 LB: > { %s1026_s21 = sadd.s32 4294967295, %s1226_s20   ;;  %s1027_s22 = sadd.s32 4294967294, %s1226_s20   ;;  %s1226_s20 = sphi %s1269_s20, %s18_s20   ;;  %s1222_s19 = sphi %s1267_s19, %s1414_s19   ;;  %s1218_s18 = sphi %s1265_s18, %s1413_s18   ;;  %s1214_s17 = sphi %s1263_s17, %s1412_s17   ;;  %s1210_s16 = sphi %s1261_s16, %s1411_s16   ;;  %s1206_s15 = sphi %s1259_s15, %s1410_s15  }
   0x6   : > { %s30_s23 = sadd.s32 1, %s1222_s19  ;;  %s138_s24 = sadd.s32 1, %s1214_s17 }
   0x7   : > { %p32_p0 = scmp.ge.s32.totalorder %s30_s23, 2  ;;  %p148_p1 = scmp.ne.s32.totalorder %s1214_s17, %s1210_s16 }
   0x8   : > { %p149_p2 = scmp.eq.s32.totalorder %s1026_s21, 1  ;;  %p154_p3 = scmp.ne.s32.totalorder %s1210_s16, %s1206_s15 }
   0x9   : > { %s1416_s23 = smov (%p32_p0, %s30_s23), 0  ;;  %p155_p5 = scmp.eq.s32.totalorder %s1027_s22, 1 }
   0xa   : > { %p1299_p4 = por %p149_p2, %p148_p1  ;;  %s133_s26 = ssub.s32 %s1222_s19, %s1416_s23 }
   0xb   : > { %p1028_p6 = scmp.ge.s32.totalorder %s1226_s20, 1  ;;  %p136_p7 = scmp.eq.s32.totalorder %s133_s26, 0 }
   0xc   : > { %p1306_p8 = por %p155_p5, %p154_p3  ;;  %p162_p9 = scmp.lt.s32.totalorder %s1226_s20, 3 }
   0xd   : > { %s1312_s28 = scalar_select %p136_p7, %s1214_s17, %s138_s24  }
   0xe   : > { %p1314_p10 = pnand %p1028_p6, %p162_p9  ;;  %p1318_p11 = scmp.eq.s32.totalorder %s1026_s21, 0 }
   0xf   : > { %s1228_s5 = smov [#allocation2]  }
  0x10   : > { %p1054_p12 = pneg %p1314_p10  ;;  %s174_s6 = sshll.u32 %s1228_s5, 4  ;;  %s175_s6 = int_to_ptr.vmem [resolvable:$true] %s174_s6 }
  0x11   : > { %s1131_s7 = scalar_lea.vmem %s175_s6, 32768  ;;  %p1139_p5 = scmp.lt.s32.totalorder %s175_s6, %s175_s6 }
  0x12   : > { %p1055_p13 = pnand %p1318_p11, %p1054_p12  ;;  %p1132_p1 = scmp.ne.s32.totalorder %s175_s6, %s1131_s7 }
  0x13   : > { %p1140_p6 = scmp.lt.s32.totalorder %s1131_s7, %s1131_s7 }
  0x14   : > { %p1122_p0 = pneg %p1055_p13 }
  0x15   : > { %p1141_p7 = por %p1140_p6, %p1139_p5 }
  0x16   : > { %p1134_p2 = pnand %p1132_p1, %p1122_p0 }
  0x18   : > { %p1135_p3 = pneg %p1134_p2 }
  0x1a   : > { %p1142_p9 = pnand %p1141_p7, %p1135_p3 }
  0x1c   : > { %1145 = shalt.err (!%p1142_p9)
}
  0x1d   : > { %s1229_s8 = smov 1024   ;;  %s1230_s9 = smov 64  }
  0x1e   : > { %1057 = dma.hbm_to_vmem [thread:$0]  (!%p1055_p13), %s1402_s1, 32768, %s175_s6, [#allocation3], %s1229_s8, %s1229_s8, %s1230_s9  }
  0x1f   : > { %212 = sbr.rel (%p1314_p10) target bundleno = 519 (0x207), region = 36 }
  0x24   : > { %1197 = dma.done.wait (%p1318_p11), [#allocation3], 32768  }
  0x25   : > { %1199 = vsyncadd (%p1318_p11), [#allocation3], 4294934528  ;;  %p246_p12 = scmp.lt.s32.totalorder %s1218_s18, 1  ;;  %v1231_v0 = vmov 0.0   ;;  %vm267_vm0 = vcmask 1043456   ;;  %v464_v2 = vld [vmem:[#allocation2 + $0x3c8] sm:$0xff] }
  0x26   : > { %336 = vmatprep.mubr.f32.mxu0 %v1231_v0  ;;  %v259_v4 = vld [vmem:[%s1403_s2] sm:$0xff]  ;;  %605 = vmatprep.subr.mxu1 %v464_v2  ;;  %vm263_vm1 = vcmask 31744   ;;  %v466_v6 = vld [vmem:[#allocation2 + $0x3d8] sm:$0xff]  ;;  %v456_v7 = vld [vmem:[#allocation2 + $0x388] sm:$0xff]  ;;  %s243_s5 = sand.u32 1, %s1210_s16   ;;  %s1047_s8 = sshll.u32 %s1218_s18, 10 }
  0x27   : > { %s247_s12 = scalar_select %p246_p12, %s1218_s18, 1  ;;  %v463_v5 = vld [vmem:[#allocation2 + $0x3c0] sm:$0xff]  ;;  %v465_v9 = vld [vmem:[#allocation2 + $0x3d0] sm:$0xff]  ;;  %v448_v10 = vld [vmem:[#allocation2 + $0x348] sm:$0xff] }
  0x28   : > { %606 = vmatpush1.msra.mxu1 %v463_v5  ;;  %v455_v8 = vld [vmem:[#allocation2 + $0x380] sm:$0xff]  ;;  %v458_v11 = vld [vmem:[#allocation2 + $0x398] sm:$0xff]  ;;  %v457_v13 = vld [vmem:[#allocation2 + $0x390] sm:$0xff]  ;;  %s1035_s6 = sshll.u32 %s243_s5, 6  ;;  %s898_s18 = scalar_lea.sflag [#allocation4], %s243_s5 }
  0x29   : > { %s1046_s13 = sshll.u32 %s247_s12, 3  ;;  %607 = vmatprep.subr.mxu1 %v456_v7  ;;  %v447_v12 = vld [vmem:[#allocation2 + $0x340] sm:$0xff]  ;;  %v440_v14 = vld [vmem:[#allocation2 + $0x308] sm:$0xff]  ;;  %v450_v15 = vld [vmem:[#allocation2 + $0x358] sm:$0xff]  ;;  %s245_s7 = scalar_lea.vmem [#allocation5], %s1035_s6 }
  0x2a   : > { %s250_s22 = scalar_lea.vmem %s1401_s0, %s1046_s13  ;;  %608 = vmatpush1.msra.mxu1 %v455_v8  ;;  %v439_v16 = vld [vmem:[#allocation2 + $0x300] sm:$0xff]  ;;  %v449_v17 = vld [vmem:[#allocation2 + $0x350] sm:$0xff]  ;;  %v432_v18 = vld [vmem:[#allocation2 + $0x2c8] sm:$0xff]  ;;  %s914_s9 = sshll.u32 %s245_s7, 4  ;;  %s915_s9 = int_to_ptr.vmem [resolvable:$true] %s914_s9 }
  0x2b   : > { %v260_v1 = vld [vmem:[%s250_s22] sm:$0xff]  ;;  %609 = vmatprep.subr.mxu1 %v448_v10  ;;  %v442_v19 = vld [vmem:[#allocation2 + $0x318] sm:$0xff]  ;;  %v441_v21 = vld [vmem:[#allocation2 + $0x310] sm:$0xff]  ;;  %s1359_s12 = scalar_lea.hbm %s1405_s4, %s1047_s8  ;;  %s1146_s13 = scalar_lea.vmem %s915_s9, 1024 }
  0x2c   : > { %v262_v3 = vcombine.high %v260_v1, %v260_v1  ;;  %610 = vmatpush1.msra.mxu1 %v447_v12  ;;  %v431_v20 = vld [vmem:[#allocation2 + $0x2c0] sm:$0xff]  ;;  %v424_v22 = vld [vmem:[#allocation2 + $0x288] sm:$0xff]  ;;  %v434_v23 = vld [vmem:[#allocation2 + $0x2d8] sm:$0xff]  ;;  %p1147_p10 = scmp.ne.s32.totalorder %s915_s9, %s1146_s13  ;;  %s1233_s14 = smov [#allocation5]  }
  0x2d   : > { %611 = vmatprep.subr.mxu1 %v440_v14  ;;  %v423_v24 = vld [vmem:[#allocation2 + $0x280] sm:$0xff]  ;;  %v433_v25 = vld [vmem:[#allocation2 + $0x2d0] sm:$0xff]  ;;  %v416_v26 = vld [vmem:[#allocation2 + $0x248] sm:$0xff]  ;;  %s1150_s21 = sshll.u32 %s1233_s14, 4  ;;  %s1151_s21 = int_to_ptr.vmem [resolvable:$false] %s1150_s21 }
  0x2e   : > { %1038 = vmatprep.subr.msk.mxu0 %vm267_vm0, %v262_v3  ;;  %612 = vmatpush1.msra.mxu1 %v439_v16  ;;  %v426_v27 = vld [vmem:[#allocation2 + $0x298] sm:$0xff]  ;;  %v415_v28 = vld [vmem:[#allocation2 + $0x240] sm:$0xff]  ;;  %v425_v29 = vld [vmem:[#allocation2 + $0x290] sm:$0xff]  ;;  %p1148_p11 = pnand %p1147_p10, %p1299_p4  ;;  %s1152_s22 = scalar_lea.vmem %s1151_s21, 2048 }
  0x2f   : > { %1039 = vmatpush1.msk.msra.mxu0 %vm267_vm0, %v260_v1  ;;  %613 = vmatprep.subr.mxu1 %v432_v18  ;;  %v408_v30 = vld [vmem:[#allocation2 + $0x208] sm:$0xff]  ;;  %v418_v31 = vld [vmem:[#allocation2 + $0x258] sm:$0xff]  ;;  %v407_v32 = vld [vmem:[#allocation2 + $0x200] sm:$0xff]  ;;  %p1153_p0 = scmp.lt.s32.totalorder %s915_s9, %s1151_s21  ;;  %p1154_p1 = scmp.lt.s32.totalorder %s1152_s22, %s1146_s13 }
  0x30   : > { %1040 = vmatmul.mubr.msk.f32.vlgmr.msra.gmra.mxu0 %vm263_vm1, %v259_v4  ;;  %676 = vmatprep.subr.mxu0 %v466_v6  ;;  %v417_v33 = vld [vmem:[#allocation2 + $0x250] sm:$0xff]  ;;  %v400_v34 = vld [vmem:[#allocation2 + $0x1c8] sm:$0xff]  ;;  %v410_v35 = vld [vmem:[#allocation2 + $0x218] sm:$0xff]  ;;  %p1149_p13 = pneg %p1148_p11 }
  0x31   : > { %677 = vmatpush1.msra.mxu0 %v465_v9  ;;  %614 = vmatpush1.msra.mxu1 %v431_v20  ;;  %v399_v36 = vld [vmem:[#allocation2 + $0x1c0] sm:$0xff]  ;;  %v409_v37 = vld [vmem:[#allocation2 + $0x210] sm:$0xff]  ;;  %v392_v38 = vld [vmem:[#allocation2 + $0x188] sm:$0xff]  ;;  %p1155_p2 = por %p1154_p1, %p1153_p0 }
  0x32   : > { %678 = vmatprep.subr.mxu0 %v458_v11  ;;  %615 = vmatprep.subr.mxu1 %v424_v22  ;;  %v402_v39 = vld [vmem:[#allocation2 + $0x1d8] sm:$0xff]  ;;  %v391_v40 = vld [vmem:[#allocation2 + $0x180] sm:$0xff]  ;;  %v401_v41 = vld [vmem:[#allocation2 + $0x1d0] sm:$0xff] }
  0x33   : > { %679 = vmatpush1.msra.mxu0 %v457_v13  ;;  %616 = vmatpush1.msra.mxu1 %v423_v24  ;;  %v384_v42 = vld [vmem:[#allocation2 + $0x148] sm:$0xff]  ;;  %v394_v43 = vld [vmem:[#allocation2 + $0x198] sm:$0xff]  ;;  %v383_v44 = vld [vmem:[#allocation2 + $0x140] sm:$0xff]  ;;  %p1156_p3 = pnand %p1155_p2, %p1149_p13 }
  0x34   : > { %680 = vmatprep.subr.mxu0 %v450_v15  ;;  %617 = vmatprep.subr.mxu1 %v416_v26  ;;  %v393_v45 = vld [vmem:[#allocation2 + $0x190] sm:$0xff]  ;;  %v376_v46 = vld [vmem:[#allocation2 + $0x108] sm:$0xff]  ;;  %v386_v47 = vld [vmem:[#allocation2 + $0x158] sm:$0xff] }
  0x35   : > { %681 = vmatpush1.msra.mxu0 %v449_v17  ;;  %618 = vmatpush1.msra.mxu1 %v415_v28  ;;  %v375_v48 = vld [vmem:[#allocation2 + $0x100] sm:$0xff]  ;;  %v385_v49 = vld [vmem:[#allocation2 + $0x150] sm:$0xff]  ;;  %v368_v50 = vld [vmem:[#allocation2 + $0xc8] sm:$0xff] }
  0x36   : > { %682 = vmatprep.subr.mxu0 %v442_v19  ;;  %619 = vmatprep.subr.mxu1 %v408_v30  ;;  %v378_v51 = vld [vmem:[#allocation2 + $0x118] sm:$0xff]  ;;  %v367_v52 = vld [vmem:[#allocation2 + $0xc0] sm:$0xff]  ;;  %v377_v53 = vld [vmem:[#allocation2 + $0x110] sm:$0xff] }
  0x37   : > { %683 = vmatpush1.msra.mxu0 %v441_v21  ;;  %620 = vmatpush1.msra.mxu1 %v407_v32  ;;  %v360_v54 = vld [vmem:[#allocation2 + $0x88] sm:$0xff]  ;;  %v370_v55 = vld [vmem:[#allocation2 + $0xd8] sm:$0xff]  ;;  %v359_v56 = vld [vmem:[#allocation2 + $0x80] sm:$0xff] }
  0x38   : > { %684 = vmatprep.subr.mxu0 %v434_v23  ;;  %621 = vmatprep.subr.mxu1 %v400_v34  ;;  %v369_v57 = vld [vmem:[#allocation2 + $0xd0] sm:$0xff]  ;;  %v352_v58 = vld [vmem:[#allocation2 + $0x48] sm:$0xff]  ;;  %v362_v59 = vld [vmem:[#allocation2 + $0x98] sm:$0xff] }
  0x39   : > { %685 = vmatpush1.msra.mxu0 %v433_v25  ;;  %622 = vmatpush1.msra.mxu1 %v399_v36  ;;  %v351_v60 = vld [vmem:[#allocation2 + $0x40] sm:$0xff]  ;;  %v361_v61 = vld [vmem:[#allocation2 + $0x90] sm:$0xff]  ;;  %v344_v62 = vld [vmem:[#allocation2 + $0x8] sm:$0xff] }
  0x3a   : > { %686 = vmatprep.subr.mxu0 %v426_v27  ;;  %623 = vmatprep.subr.mxu1 %v392_v38  ;;  %v354_v63 = vld [vmem:[#allocation2 + $0x58] sm:$0xff]  ;;  %v343_v0 = vld [vmem:[#allocation2] sm:$0xff]  ;;  %v353_v1 = vld [vmem:[#allocation2 + $0x50] sm:$0xff] }
  0x3b   : > { %687 = vmatpush1.msra.mxu0 %v425_v29  ;;  %624 = vmatpush1.msra.mxu1 %v391_v40  ;;  %v592_v2 = vld [vmem:[#allocation2 + $0x7c8] sm:$0xff]  ;;  %v346_v3 = vld [vmem:[#allocation2 + $0x18] sm:$0xff]  ;;  %v591_v4 = vld [vmem:[#allocation2 + $0x7c0] sm:$0xff] }
  0x3c   : > { %688 = vmatprep.subr.mxu0 %v418_v31  ;;  %625 = vmatprep.subr.mxu1 %v384_v42  ;;  %v345_v5 = vld [vmem:[#allocation2 + $0x10] sm:$0xff]  ;;  %v584_v6 = vld [vmem:[#allocation2 + $0x788] sm:$0xff]  ;;  %v594_v7 = vld [vmem:[#allocation2 + $0x7d8] sm:$0xff] }
  0x3d   : > { %689 = vmatpush1.msra.mxu0 %v417_v33  ;;  %626 = vmatpush1.msra.mxu1 %v383_v44  ;;  %v583_v8 = vld [vmem:[#allocation2 + $0x780] sm:$0xff]  ;;  %v593_v9 = vld [vmem:[#allocation2 + $0x7d0] sm:$0xff]  ;;  %v576_v10 = vld [vmem:[#allocation2 + $0x748] sm:$0xff] }
  0x3e   : > { %690 = vmatprep.subr.mxu0 %v410_v35  ;;  %627 = vmatprep.subr.mxu1 %v376_v46  ;;  %v586_v11 = vld [vmem:[#allocation2 + $0x798] sm:$0xff]  ;;  %v575_v12 = vld [vmem:[#allocation2 + $0x740] sm:$0xff]  ;;  %v585_v13 = vld [vmem:[#allocation2 + $0x790] sm:$0xff] }
  0x3f   : > { %691 = vmatpush1.msra.mxu0 %v409_v37  ;;  %628 = vmatpush1.msra.mxu1 %v375_v48  ;;  %v568_v14 = vld [vmem:[#allocation2 + $0x708] sm:$0xff]  ;;  %v578_v15 = vld [vmem:[#allocation2 + $0x758] sm:$0xff]  ;;  %v567_v16 = vld [vmem:[#allocation2 + $0x700] sm:$0xff] }
  0x40   : > { %692 = vmatprep.subr.mxu0 %v402_v39  ;;  %629 = vmatprep.subr.mxu1 %v368_v50  ;;  %v577_v17 = vld [vmem:[#allocation2 + $0x750] sm:$0xff]  ;;  %v560_v18 = vld [vmem:[#allocation2 + $0x6c8] sm:$0xff]  ;;  %v570_v19 = vld [vmem:[#allocation2 + $0x718] sm:$0xff] }
  0x41   : > { %693 = vmatpush1.msra.mxu0 %v401_v41  ;;  %630 = vmatpush1.msra.mxu1 %v367_v52  ;;  %v559_v20 = vld [vmem:[#allocation2 + $0x6c0] sm:$0xff]  ;;  %v569_v21 = vld [vmem:[#allocation2 + $0x710] sm:$0xff]  ;;  %v552_v22 = vld [vmem:[#allocation2 + $0x688] sm:$0xff] }
  0x42   : > { %694 = vmatprep.subr.mxu0 %v394_v43  ;;  %631 = vmatprep.subr.mxu1 %v360_v54  ;;  %v562_v23 = vld [vmem:[#allocation2 + $0x6d8] sm:$0xff]  ;;  %v551_v24 = vld [vmem:[#allocation2 + $0x680] sm:$0xff]  ;;  %v561_v25 = vld [vmem:[#allocation2 + $0x6d0] sm:$0xff] }
  0x43   : > { %695 = vmatpush1.msra.mxu0 %v393_v45  ;;  %632 = vmatpush1.msra.mxu1 %v359_v56  ;;  %v544_v26 = vld [vmem:[#allocation2 + $0x648] sm:$0xff]  ;;  %v554_v27 = vld [vmem:[#allocation2 + $0x698] sm:$0xff]  ;;  %v543_v28 = vld [vmem:[#allocation2 + $0x640] sm:$0xff] }
  0x44   : > { %696 = vmatprep.subr.mxu0 %v386_v47  ;;  %633 = vmatprep.subr.mxu1 %v352_v58  ;;  %v553_v29 = vld [vmem:[#allocation2 + $0x690] sm:$0xff]  ;;  %v536_v30 = vld [vmem:[#allocation2 + $0x608] sm:$0xff]  ;;  %v546_v31 = vld [vmem:[#allocation2 + $0x658] sm:$0xff] }
  0x45   : > { %697 = vmatpush1.msra.mxu0 %v385_v49  ;;  %634 = vmatpush1.msra.mxu1 %v351_v60  ;;  %v535_v32 = vld [vmem:[#allocation2 + $0x600] sm:$0xff]  ;;  %v545_v33 = vld [vmem:[#allocation2 + $0x650] sm:$0xff]  ;;  %v528_v34 = vld [vmem:[#allocation2 + $0x5c8] sm:$0xff] }
  0x46   : > { %698 = vmatprep.subr.mxu0 %v378_v51  ;;  %635 = vmatprep.subr.mxu1 %v344_v62  ;;  %v538_v35 = vld [vmem:[#allocation2 + $0x618] sm:$0xff]  ;;  %v527_v36 = vld [vmem:[#allocation2 + $0x5c0] sm:$0xff]  ;;  %v537_v37 = vld [vmem:[#allocation2 + $0x610] sm:$0xff] }
  0x47   : > { %699 = vmatpush1.msra.mxu0 %v377_v53  ;;  %636 = vmatpush1.msra.mxu1 %v343_v0  ;;  %v520_v38 = vld [vmem:[#allocation2 + $0x588] sm:$0xff]  ;;  %v530_v39 = vld [vmem:[#allocation2 + $0x5d8] sm:$0xff]  ;;  %v519_v40 = vld [vmem:[#allocation2 + $0x580] sm:$0xff] }
  0x48   : > { %700 = vmatprep.subr.mxu0 %v370_v55  ;;  %637 = vmatprep.subr.mxu1 %v592_v2  ;;  %v529_v41 = vld [vmem:[#allocation2 + $0x5d0] sm:$0xff]  ;;  %v512_v42 = vld [vmem:[#allocation2 + $0x548] sm:$0xff]  ;;  %v522_v43 = vld [vmem:[#allocation2 + $0x598] sm:$0xff] }
  0x49   : > { %701 = vmatpush1.msra.mxu0 %v369_v57  ;;  %638 = vmatpush2.msra.mxu1 %v591_v4  ;;  %v511_v44 = vld [vmem:[#allocation2 + $0x540] sm:$0xff]  ;;  %v521_v45 = vld [vmem:[#allocation2 + $0x590] sm:$0xff]  ;;  %v504_v46 = vld [vmem:[#allocation2 + $0x508] sm:$0xff] }
  0x4a   : > { %702 = vmatprep.subr.mxu0 %v362_v59  ;;  %639 = vmatprep.subr.mxu1 %v584_v6  ;;  %v514_v47 = vld [vmem:[#allocation2 + $0x558] sm:$0xff]  ;;  %v503_v48 = vld [vmem:[#allocation2 + $0x500] sm:$0xff]  ;;  %v513_v49 = vld [vmem:[#allocation2 + $0x550] sm:$0xff] }
  0x4b   : > { %703 = vmatpush1.msra.mxu0 %v361_v61  ;;  %640 = vmatpush2.msra.mxu1 %v583_v8  ;;  %v496_v50 = vld [vmem:[#allocation2 + $0x4c8] sm:$0xff]  ;;  %v506_v51 = vld [vmem:[#allocation2 + $0x518] sm:$0xff]  ;;  %v495_v52 = vld [vmem:[#allocation2 + $0x4c0] sm:$0xff] }
  0x4c   : > { %704 = vmatprep.subr.mxu0 %v354_v63  ;;  %641 = vmatprep.subr.mxu1 %v576_v10  ;;  %v505_v53 = vld [vmem:[#allocation2 + $0x510] sm:$0xff]  ;;  %v488_v54 = vld [vmem:[#allocation2 + $0x488] sm:$0xff]  ;;  %v498_v55 = vld [vmem:[#allocation2 + $0x4d8] sm:$0xff] }
  0x4d   : > { %705 = vmatpush1.msra.mxu0 %v353_v1  ;;  %642 = vmatpush2.msra.mxu1 %v575_v12  ;;  %v487_v56 = vld [vmem:[#allocation2 + $0x480] sm:$0xff]  ;;  %v497_v57 = vld [vmem:[#allocation2 + $0x4d0] sm:$0xff]  ;;  %v480_v58 = vld [vmem:[#allocation2 + $0x448] sm:$0xff] }
  0x4e   : > { %706 = vmatprep.subr.mxu0 %v346_v3  ;;  %643 = vmatprep.subr.mxu1 %v568_v14  ;;  %v490_v59 = vld [vmem:[#allocation2 + $0x498] sm:$0xff]  ;;  %v489_v60 = vld [vmem:[#allocation2 + $0x490] sm:$0xff]  ;;  %v479_v62 = vld [vmem:[#allocation2 + $0x440] sm:$0xff] }
  0x4f   : > { %707 = vmatpush1.msra.mxu0 %v345_v5  ;;  %644 = vmatpush2.msra.mxu1 %v567_v16  ;;  %v482_v61 = vld [vmem:[#allocation2 + $0x458] sm:$0xff]  ;;  %v481_v63 = vld [vmem:[#allocation2 + $0x450] sm:$0xff]  ;;  %v472_v0 = vld [vmem:[#allocation2 + $0x408] sm:$0xff] }
  0x50   : > { %708 = vmatprep.subr.mxu0 %v594_v7  ;;  %645 = vmatprep.subr.mxu1 %v560_v18  ;;  %v474_v1 = vld [vmem:[#allocation2 + $0x418] sm:$0xff]  ;;  %v471_v2 = vld [vmem:[#allocation2 + $0x400] sm:$0xff]  ;;  %v473_v3 = vld [vmem:[#allocation2 + $0x410] sm:$0xff]  ;;  %v1232_v7 = vmov 0  }
  0x51   : > { %709 = vmatpush2.msra.mxu0 %v593_v9  ;;  %646 = vmatpush2.msra.mxu1 %v559_v20  ;;  %v468_v4 = vld [vmem:[#allocation2 + $0x3e8] sm:$0xff]  ;;  %v470_v5 = vld [vmem:[#allocation2 + $0x3f8] sm:$0xff]  ;;  %v599_v6 = vld [vmem:[%s1404_s3] sm:$0xff] }
  0x52   : > { %710 = vmatprep.subr.mxu0 %v586_v11  ;;  %647 = vmatprep.subr.mxu1 %v552_v22  ;;  %v467_v10 = vld [vmem:[#allocation2 + $0x3e0] sm:$0xff]  ;;  %v469_v11 = vld [vmem:[#allocation2 + $0x3f0] sm:$0xff]  ;;  %v460_v12 = vld [vmem:[#allocation2 + $0x3a8] sm:$0xff] }
  0x53   : > { %711 = vmatpush2.msra.mxu0 %v585_v13  ;;  %648 = vmatpush2.msra.mxu1 %v551_v24  ;;  %v462_v13 = vld [vmem:[#allocation2 + $0x3b8] sm:$0xff]  ;;  %v459_v14 = vld [vmem:[#allocation2 + $0x3a0] sm:$0xff]  ;;  %v452_v16 = vld [vmem:[#allocation2 + $0x368] sm:$0xff] }
  0x54   : > { %712 = vmatprep.subr.mxu0 %v578_v15  ;;  %649 = vmatprep.subr.mxu1 %v544_v26  ;;  %v461_v15 = vld [vmem:[#allocation2 + $0x3b0] sm:$0xff]  ;;  %v451_v18 = vld [vmem:[#allocation2 + $0x360] sm:$0xff]  ;;  %v444_v20 = vld [vmem:[#allocation2 + $0x328] sm:$0xff] }
  0x55   : > { %713 = vmatpush2.msra.mxu0 %v577_v17  ;;  %650 = vmatpush2.msra.mxu1 %v543_v28  ;;  %v454_v17 = vld [vmem:[#allocation2 + $0x378] sm:$0xff]  ;;  %v443_v22 = vld [vmem:[#allocation2 + $0x320] sm:$0xff]  ;;  %v436_v24 = vld [vmem:[#allocation2 + $0x2e8] sm:$0xff] }
  0x56   : > { %714 = vmatprep.subr.mxu0 %v570_v19  ;;  %651 = vmatprep.subr.mxu1 %v536_v30  ;;  %v453_v19 = vld [vmem:[#allocation2 + $0x370] sm:$0xff]  ;;  %v435_v26 = vld [vmem:[#allocation2 + $0x2e0] sm:$0xff]  ;;  %v428_v28 = vld [vmem:[#allocation2 + $0x2a8] sm:$0xff] }
  0x57   : > { %715 = vmatpush2.msra.mxu0 %v569_v21  ;;  %652 = vmatpush2.msra.mxu1 %v535_v32  ;;  %v446_v21 = vld [vmem:[#allocation2 + $0x338] sm:$0xff]  ;;  %v427_v30 = vld [vmem:[#allocation2 + $0x2a0] sm:$0xff]  ;;  %v420_v32 = vld [vmem:[#allocation2 + $0x268] sm:$0xff] }
  0x58   : > { %716 = vmatprep.subr.mxu0 %v562_v23  ;;  %653 = vmatprep.subr.mxu1 %v528_v34  ;;  %v445_v23 = vld [vmem:[#allocation2 + $0x330] sm:$0xff]  ;;  %v419_v34 = vld [vmem:[#allocation2 + $0x260] sm:$0xff] }
  0x59   : > { %717 = vmatpush2.msra.mxu0 %v561_v25  ;;  %654 = vmatpush2.msra.mxu1 %v527_v36  ;;  %v438_v25 = vld [vmem:[#allocation2 + $0x2f8] sm:$0xff]  ;;  %v412_v36 = vld [vmem:[#allocation2 + $0x228] sm:$0xff] }
  0x5a   : > { %718 = vmatprep.subr.mxu0 %v554_v27  ;;  %655 = vmatprep.subr.mxu1 %v520_v38  ;;  %v437_v27 = vld [vmem:[#allocation2 + $0x2f0] sm:$0xff]  ;;  %v411_v38 = vld [vmem:[#allocation2 + $0x220] sm:$0xff] }
  0x5b   : > { %719 = vmatpush2.msra.mxu0 %v553_v29  ;;  %656 = vmatpush2.msra.mxu1 %v519_v40  ;;  %v430_v29 = vld [vmem:[#allocation2 + $0x2b8] sm:$0xff]  ;;  %v404_v40 = vld [vmem:[#allocation2 + $0x1e8] sm:$0xff] }
  0x5c   : > { %720 = vmatprep.subr.mxu0 %v546_v31  ;;  %657 = vmatprep.subr.mxu1 %v512_v42  ;;  %v429_v31 = vld [vmem:[#allocation2 + $0x2b0] sm:$0xff]  ;;  %v403_v42 = vld [vmem:[#allocation2 + $0x1e0] sm:$0xff] }
  0x5d   : > { %721 = vmatpush2.msra.mxu0 %v545_v33  ;;  %658 = vmatpush2.msra.mxu1 %v511_v44  ;;  %v422_v33 = vld [vmem:[#allocation2 + $0x278] sm:$0xff]  ;;  %v396_v44 = vld [vmem:[#allocation2 + $0x1a8] sm:$0xff] }
  0x5e   : > { %722 = vmatprep.subr.mxu0 %v538_v35  ;;  %659 = vmatprep.subr.mxu1 %v504_v46  ;;  %v421_v35 = vld [vmem:[#allocation2 + $0x270] sm:$0xff]  ;;  %v395_v46 = vld [vmem:[#allocation2 + $0x1a0] sm:$0xff] }
  0x5f   : > { %723 = vmatpush2.msra.mxu0 %v537_v37  ;;  %660 = vmatpush2.msra.mxu1 %v503_v48  ;;  %v414_v37 = vld [vmem:[#allocation2 + $0x238] sm:$0xff]  ;;  %v388_v48 = vld [vmem:[#allocation2 + $0x168] sm:$0xff] }
  0x60   : > { %724 = vmatprep.subr.mxu0 %v530_v39  ;;  %661 = vmatprep.subr.mxu1 %v496_v50  ;;  %v413_v39 = vld [vmem:[#allocation2 + $0x230] sm:$0xff]  ;;  %v387_v50 = vld [vmem:[#allocation2 + $0x160] sm:$0xff] }
  0x61   : > { %725 = vmatpush2.msra.mxu0 %v529_v41  ;;  %662 = vmatpush2.msra.mxu1 %v495_v52  ;;  %v406_v41 = vld [vmem:[#allocation2 + $0x1f8] sm:$0xff]  ;;  %v380_v52 = vld [vmem:[#allocation2 + $0x128] sm:$0xff] }
  0x62   : > { %726 = vmatprep.subr.mxu0 %v522_v43  ;;  %663 = vmatprep.subr.mxu1 %v488_v54  ;;  %v405_v43 = vld [vmem:[#allocation2 + $0x1f0] sm:$0xff]  ;;  %v379_v54 = vld [vmem:[#allocation2 + $0x120] sm:$0xff] }
  0x63   : > { %727 = vmatpush2.msra.mxu0 %v521_v45  ;;  %664 = vmatpush2.msra.mxu1 %v487_v56  ;;  %v398_v45 = vld [vmem:[#allocation2 + $0x1b8] sm:$0xff]  ;;  %v372_v56 = vld [vmem:[#allocation2 + $0xe8] sm:$0xff] }
  0x64   : > { %728 = vmatprep.subr.mxu0 %v514_v47  ;;  %665 = vmatprep.subr.mxu1 %v480_v58  ;;  %v397_v47 = vld [vmem:[#allocation2 + $0x1b0] sm:$0xff]  ;;  %v371_v58 = vld [vmem:[#allocation2 + $0xe0] sm:$0xff] }
  0x65   : > { %729 = vmatpush2.msra.mxu0 %v513_v49  ;;  %666 = vmatpush2.msra.mxu1 %v479_v62  ;;  %v390_v49 = vld [vmem:[#allocation2 + $0x178] sm:$0xff]  ;;  %v363_v62 = vld [vmem:[#allocation2 + $0xa0] sm:$0xff] }
  0x66   : > { %730 = vmatprep.subr.mxu0 %v506_v51  ;;  %667 = vmatprep.subr.mxu1 %v472_v0  ;;  %v389_v51 = vld [vmem:[#allocation2 + $0x170] sm:$0xff]  ;;  %v356_v0 = vld [vmem:[#allocation2 + $0x68] sm:$0xff] }
  0x67   : > { %731 = vmatpush2.msra.mxu0 %v505_v53  ;;  %668 = vmatpush2.msra.mxu1 %v471_v2  ;;  %v382_v53 = vld [vmem:[#allocation2 + $0x138] sm:$0xff]  ;;  %v355_v2 = vld [vmem:[#allocation2 + $0x60] sm:$0xff] }
  0x68   : > { %732 = vmatprep.subr.mxu0 %v498_v55  ;;  %747 = vmatprep.subr.mxu1 %v468_v4  ;;  %v381_v55 = vld [vmem:[#allocation2 + $0x130] sm:$0xff]  ;;  %v348_v4 = vld [vmem:[#allocation2 + $0x28] sm:$0xff] }
  0x69   : > { %733 = vmatpush2.msra.mxu0 %v497_v57  ;;  %1118 = vset.pattern.permute.xlu0 %v1232_v7  ;;  %v374_v57 = vld [vmem:[#allocation2 + $0xf8] sm:$0xff]  ;;  %v349_v7 = vld [vmem:[#allocation2 + $0x30] sm:$0xff] }
  0x6a   : > { %734 = vmatprep.subr.mxu0 %v490_v59  ;;  %602 = vperm.xlu0 %1118, %v599_v6   ;;  %v373_v59 = vld [vmem:[#allocation2 + $0xf0] sm:$0xff]  ;;  %v347_v6 = vld [vmem:[#allocation2 + $0x20] sm:$0xff] }
  0x6b   : > { %735 = vmatpush2.msra.mxu0 %v489_v60  ;;  %v364_v60 = vld [vmem:[#allocation2 + $0xa8] sm:$0xff] }
  0x6c   : > { %736 = vmatprep.subr.mxu0 %v482_v61  ;;  %v366_v61 = vld [vmem:[#allocation2 + $0xb8] sm:$0xff] }
  0x6d   : > { %737 = vmatpush2.msra.mxu0 %v481_v63  ;;  %v365_v63 = vld [vmem:[#allocation2 + $0xb0] sm:$0xff] }
  0x6e   : > { %738 = vmatprep.subr.mxu0 %v474_v1  ;;  %v358_v1 = vld [vmem:[#allocation2 + $0x78] sm:$0xff] }
  0x6f   : > { %739 = vmatpush2.msra.mxu0 %v473_v3  ;;  %v357_v3 = vld [vmem:[#allocation2 + $0x70] sm:$0xff] }
  0x70   : > { %818 = vmatprep.subr.mxu0 %v470_v5  ;;  %v350_v5 = vld [vmem:[#allocation2 + $0x38] sm:$0xff] }
  0xf0   : > { %v1346_v8 = vpop.f32.mrf.mxu0 }
  0xf2   : > { %v340_v9 = vpop.f32.mrf.mxu0 }
  0xf3   : > { %669 = vmatprep.mubr.f32.mxu1 %v340_v9  ;;  %740 = vmatprep.mubr.f32.mxu0 %v340_v9 }
  0xf4   : > { %670 = vmatmul.mubr.f32.vlgmr.msra.gmra.mxu1 %v1346_v8  ;;  %741 = vmatmul.mubr.f32.vlgmr.msra.gmra.mxu0 %v1346_v8 }
  0xf5   : > { %748 = vmatpush1.msra.mxu1 %v467_v10  ;;  %819 = vmatpush1.msra.mxu0 %v469_v11  ;;  %v598_v10 = vld [vmem:[#allocation2 + $0x7f8] sm:$0xff]  ;;  %v595_v11 = vld [vmem:[#allocation2 + $0x7e0] sm:$0xff] }
  0xf6   : > { %749 = vmatprep.subr.mxu1 %v460_v12  ;;  %811 = vmatprep.mubr.f32.mxu1 %v340_v9  ;;  %v597_v12 = vld [vmem:[#allocation2 + $0x7f0] sm:$0xff] }
  0xf7   : > { %820 = vmatprep.subr.mxu0 %v462_v13  ;;  %882 = vmatprep.mubr.f32.mxu0 %v340_v9  ;;  %v596_v9 = vld [vmem:[#allocation2 + $0x7e8] sm:$0xff] }
  0xf8   : > { %750 = vmatpush1.msra.mxu1 %v459_v14  ;;  %821 = vmatpush1.msra.mxu0 %v461_v15  ;;  %v588_v13 = vld [vmem:[#allocation2 + $0x7a8] sm:$0xff]  ;;  %v590_v14 = vld [vmem:[#allocation2 + $0x7b8] sm:$0xff]  ;;  %v587_v15 = vld [vmem:[#allocation2 + $0x7a0] sm:$0xff] }
  0xf9   : > { %751 = vmatprep.subr.mxu1 %v452_v16  ;;  %822 = vmatprep.subr.mxu0 %v454_v17  ;;  %v589_v16 = vld [vmem:[#allocation2 + $0x7b0] sm:$0xff]  ;;  %v580_v17 = vld [vmem:[#allocation2 + $0x768] sm:$0xff] }
  0xfa   : > { %752 = vmatpush1.msra.mxu1 %v451_v18  ;;  %823 = vmatpush1.msra.mxu0 %v453_v19  ;;  %v582_v18 = vld [vmem:[#allocation2 + $0x778] sm:$0xff]  ;;  %v579_v19 = vld [vmem:[#allocation2 + $0x760] sm:$0xff] }
  0xfb   : > { %753 = vmatprep.subr.mxu1 %v444_v20  ;;  %824 = vmatprep.subr.mxu0 %v446_v21  ;;  %v581_v20 = vld [vmem:[#allocation2 + $0x770] sm:$0xff]  ;;  %v572_v21 = vld [vmem:[#allocation2 + $0x728] sm:$0xff] }
  0xfc   : > { %754 = vmatpush1.msra.mxu1 %v443_v22  ;;  %825 = vmatpush1.msra.mxu0 %v445_v23  ;;  %v574_v22 = vld [vmem:[#allocation2 + $0x738] sm:$0xff]  ;;  %v571_v23 = vld [vmem:[#allocation2 + $0x720] sm:$0xff] }
  0xfd   : > { %755 = vmatprep.subr.mxu1 %v436_v24  ;;  %826 = vmatprep.subr.mxu0 %v438_v25  ;;  %v573_v24 = vld [vmem:[#allocation2 + $0x730] sm:$0xff]  ;;  %v564_v25 = vld [vmem:[#allocation2 + $0x6e8] sm:$0xff] }
  0xfe   : > { %756 = vmatpush1.msra.mxu1 %v435_v26  ;;  %827 = vmatpush1.msra.mxu0 %v437_v27  ;;  %v566_v26 = vld [vmem:[#allocation2 + $0x6f8] sm:$0xff]  ;;  %v563_v27 = vld [vmem:[#allocation2 + $0x6e0] sm:$0xff] }
  0xff   : > { %757 = vmatprep.subr.mxu1 %v428_v28  ;;  %828 = vmatprep.subr.mxu0 %v430_v29  ;;  %v565_v28 = vld [vmem:[#allocation2 + $0x6f0] sm:$0xff]  ;;  %v556_v29 = vld [vmem:[#allocation2 + $0x6a8] sm:$0xff] }
 0x100   : > { %758 = vmatpush1.msra.mxu1 %v427_v30  ;;  %829 = vmatpush1.msra.mxu0 %v429_v31  ;;  %v558_v30 = vld [vmem:[#allocation2 + $0x6b8] sm:$0xff]  ;;  %v555_v31 = vld [vmem:[#allocation2 + $0x6a0] sm:$0xff] }
 0x101   : > { %759 = vmatprep.subr.mxu1 %v420_v32  ;;  %830 = vmatprep.subr.mxu0 %v422_v33  ;;  %v557_v32 = vld [vmem:[#allocation2 + $0x6b0] sm:$0xff]  ;;  %v548_v33 = vld [vmem:[#allocation2 + $0x668] sm:$0xff] }
 0x102   : > { %760 = vmatpush1.msra.mxu1 %v419_v34  ;;  %831 = vmatpush1.msra.mxu0 %v421_v35  ;;  %v550_v34 = vld [vmem:[#allocation2 + $0x678] sm:$0xff]  ;;  %v547_v35 = vld [vmem:[#allocation2 + $0x660] sm:$0xff] }
 0x103   : > { %761 = vmatprep.subr.mxu1 %v412_v36  ;;  %832 = vmatprep.subr.mxu0 %v414_v37  ;;  %v549_v36 = vld [vmem:[#allocation2 + $0x670] sm:$0xff]  ;;  %v540_v37 = vld [vmem:[#allocation2 + $0x628] sm:$0xff] }
 0x104   : > { %762 = vmatpush1.msra.mxu1 %v411_v38  ;;  %833 = vmatpush1.msra.mxu0 %v413_v39  ;;  %v542_v38 = vld [vmem:[#allocation2 + $0x638] sm:$0xff]  ;;  %v539_v39 = vld [vmem:[#allocation2 + $0x620] sm:$0xff] }
 0x105   : > { %763 = vmatprep.subr.mxu1 %v404_v40  ;;  %834 = vmatprep.subr.mxu0 %v406_v41  ;;  %v541_v40 = vld [vmem:[#allocation2 + $0x630] sm:$0xff]  ;;  %v532_v41 = vld [vmem:[#allocation2 + $0x5e8] sm:$0xff] }
 0x106   : > { %764 = vmatpush1.msra.mxu1 %v403_v42  ;;  %835 = vmatpush1.msra.mxu0 %v405_v43  ;;  %v534_v42 = vld [vmem:[#allocation2 + $0x5f8] sm:$0xff]  ;;  %v531_v43 = vld [vmem:[#allocation2 + $0x5e0] sm:$0xff] }
 0x107   : > { %765 = vmatprep.subr.mxu1 %v396_v44  ;;  %836 = vmatprep.subr.mxu0 %v398_v45  ;;  %v533_v44 = vld [vmem:[#allocation2 + $0x5f0] sm:$0xff]  ;;  %v524_v45 = vld [vmem:[#allocation2 + $0x5a8] sm:$0xff] }
 0x108   : > { %766 = vmatpush1.msra.mxu1 %v395_v46  ;;  %837 = vmatpush1.msra.mxu0 %v397_v47  ;;  %v526_v46 = vld [vmem:[#allocation2 + $0x5b8] sm:$0xff]  ;;  %v523_v47 = vld [vmem:[#allocation2 + $0x5a0] sm:$0xff] }
 0x109   : > { %767 = vmatprep.subr.mxu1 %v388_v48  ;;  %838 = vmatprep.subr.mxu0 %v390_v49  ;;  %v525_v48 = vld [vmem:[#allocation2 + $0x5b0] sm:$0xff]  ;;  %v516_v49 = vld [vmem:[#allocation2 + $0x568] sm:$0xff] }
 0x10a   : > { %768 = vmatpush1.msra.mxu1 %v387_v50  ;;  %839 = vmatpush1.msra.mxu0 %v389_v51  ;;  %v518_v50 = vld [vmem:[#allocation2 + $0x578] sm:$0xff]  ;;  %v515_v51 = vld [vmem:[#allocation2 + $0x560] sm:$0xff] }
 0x10b   : > { %769 = vmatprep.subr.mxu1 %v380_v52  ;;  %840 = vmatprep.subr.mxu0 %v382_v53  ;;  %v517_v52 = vld [vmem:[#allocation2 + $0x570] sm:$0xff]  ;;  %v508_v53 = vld [vmem:[#allocation2 + $0x528] sm:$0xff] }
 0x10c   : > { %770 = vmatpush1.msra.mxu1 %v379_v54  ;;  %841 = vmatpush1.msra.mxu0 %v381_v55  ;;  %v510_v54 = vld [vmem:[#allocation2 + $0x538] sm:$0xff]  ;;  %v507_v55 = vld [vmem:[#allocation2 + $0x520] sm:$0xff] }
 0x10d   : > { %771 = vmatprep.subr.mxu1 %v372_v56  ;;  %842 = vmatprep.subr.mxu0 %v374_v57  ;;  %v509_v56 = vld [vmem:[#allocation2 + $0x530] sm:$0xff]  ;;  %v500_v57 = vld [vmem:[#allocation2 + $0x4e8] sm:$0xff] }
 0x10e   : > { %772 = vmatpush1.msra.mxu1 %v371_v58  ;;  %843 = vmatpush1.msra.mxu0 %v373_v59  ;;  %v502_v58 = vld [vmem:[#allocation2 + $0x4f8] sm:$0xff]  ;;  %v499_v59 = vld [vmem:[#allocation2 + $0x4e0] sm:$0xff] }
 0x10f   : > { %773 = vmatprep.subr.mxu1 %v364_v60  ;;  %844 = vmatprep.subr.mxu0 %v366_v61  ;;  %v501_v60 = vld [vmem:[#allocation2 + $0x4f0] sm:$0xff]  ;;  %v492_v61 = vld [vmem:[#allocation2 + $0x4a8] sm:$0xff] }
 0x110   : > { %774 = vmatpush1.msra.mxu1 %v363_v62  ;;  %845 = vmatpush1.msra.mxu0 %v365_v63  ;;  %v494_v62 = vld [vmem:[#allocation2 + $0x4b8] sm:$0xff]  ;;  %v491_v63 = vld [vmem:[#allocation2 + $0x4a0] sm:$0xff] }
 0x111   : > { %775 = vmatprep.subr.mxu1 %v356_v0  ;;  %846 = vmatprep.subr.mxu0 %v358_v1  ;;  %v493_v0 = vld [vmem:[#allocation2 + $0x4b0] sm:$0xff]  ;;  %v484_v1 = vld [vmem:[#allocation2 + $0x468] sm:$0xff] }
 0x112   : > { %776 = vmatpush1.msra.mxu1 %v355_v2  ;;  %847 = vmatpush1.msra.mxu0 %v357_v3  ;;  %v486_v2 = vld [vmem:[#allocation2 + $0x478] sm:$0xff]  ;;  %v483_v3 = vld [vmem:[#allocation2 + $0x460] sm:$0xff] }
 0x113   : > { %777 = vmatprep.subr.mxu1 %v348_v4  ;;  %848 = vmatprep.subr.mxu0 %v350_v5  ;;  %v485_v4 = vld [vmem:[#allocation2 + $0x470] sm:$0xff]  ;;  %v476_v5 = vld [vmem:[#allocation2 + $0x428] sm:$0xff] }
 0x114   : > { %778 = vmatpush1.msra.mxu1 %v347_v6  ;;  %849 = vmatpush1.msra.mxu0 %v349_v7  ;;  %v478_v6 = vld [vmem:[#allocation2 + $0x438] sm:$0xff]  ;;  %v475_v7 = vld [vmem:[#allocation2 + $0x420] sm:$0xff] }
 0x115   : > { %779 = vmatprep.subr.mxu1 %v596_v9  ;;  %850 = vmatprep.subr.mxu0 %v598_v10  ;;  %v477_v9 = vld [vmem:[#allocation2 + $0x430] sm:$0xff]  ;;  %v603_v10 = vpop.permute.xlu0 %602 }
 0x116   : > { %780 = vmatpush2.msra.mxu1 %v595_v11  ;;  %851 = vmatpush2.msra.mxu0 %v597_v12 }
 0x117   : > { %781 = vmatprep.subr.mxu1 %v588_v13  ;;  %852 = vmatprep.subr.mxu0 %v590_v14 }
 0x118   : > { %782 = vmatpush2.msra.mxu1 %v587_v15  ;;  %853 = vmatpush2.msra.mxu0 %v589_v16 }
 0x119   : > { %783 = vmatprep.subr.mxu1 %v580_v17  ;;  %854 = vmatprep.subr.mxu0 %v582_v18 }
 0x11a   : > { %784 = vmatpush2.msra.mxu1 %v579_v19  ;;  %855 = vmatpush2.msra.mxu0 %v581_v20 }
 0x11b   : > { %785 = vmatprep.subr.mxu1 %v572_v21  ;;  %856 = vmatprep.subr.mxu0 %v574_v22 }
 0x11c   : > { %786 = vmatpush2.msra.mxu1 %v571_v23  ;;  %857 = vmatpush2.msra.mxu0 %v573_v24 }
 0x11d   : > { %787 = vmatprep.subr.mxu1 %v564_v25  ;;  %858 = vmatprep.subr.mxu0 %v566_v26 }
 0x11e   : > { %788 = vmatpush2.msra.mxu1 %v563_v27  ;;  %859 = vmatpush2.msra.mxu0 %v565_v28 }
 0x11f   : > { %789 = vmatprep.subr.mxu1 %v556_v29  ;;  %860 = vmatprep.subr.mxu0 %v558_v30 }
 0x120   : > { %790 = vmatpush2.msra.mxu1 %v555_v31  ;;  %861 = vmatpush2.msra.mxu0 %v557_v32 }
 0x121   : > { %791 = vmatprep.subr.mxu1 %v548_v33  ;;  %862 = vmatprep.subr.mxu0 %v550_v34 }
 0x122   : > { %792 = vmatpush2.msra.mxu1 %v547_v35  ;;  %863 = vmatpush2.msra.mxu0 %v549_v36 }
 0x123   : > { %793 = vmatprep.subr.mxu1 %v540_v37  ;;  %864 = vmatprep.subr.mxu0 %v542_v38 }
 0x124   : > { %794 = vmatpush2.msra.mxu1 %v539_v39  ;;  %865 = vmatpush2.msra.mxu0 %v541_v40 }
 0x125   : > { %795 = vmatprep.subr.mxu1 %v532_v41  ;;  %866 = vmatprep.subr.mxu0 %v534_v42 }
 0x126   : > { %796 = vmatpush2.msra.mxu1 %v531_v43  ;;  %867 = vmatpush2.msra.mxu0 %v533_v44 }
 0x127   : > { %797 = vmatprep.subr.mxu1 %v524_v45  ;;  %868 = vmatprep.subr.mxu0 %v526_v46 }
 0x128   : > { %798 = vmatpush2.msra.mxu1 %v523_v47  ;;  %869 = vmatpush2.msra.mxu0 %v525_v48 }
 0x129   : > { %799 = vmatprep.subr.mxu1 %v516_v49  ;;  %870 = vmatprep.subr.mxu0 %v518_v50 }
 0x12a   : > { %800 = vmatpush2.msra.mxu1 %v515_v51  ;;  %871 = vmatpush2.msra.mxu0 %v517_v52 }
 0x12b   : > { %801 = vmatprep.subr.mxu1 %v508_v53  ;;  %872 = vmatprep.subr.mxu0 %v510_v54 }
 0x12c   : > { %802 = vmatpush2.msra.mxu1 %v507_v55  ;;  %873 = vmatpush2.msra.mxu0 %v509_v56 }
 0x12d   : > { %803 = vmatprep.subr.mxu1 %v500_v57  ;;  %874 = vmatprep.subr.mxu0 %v502_v58 }
 0x12e   : > { %804 = vmatpush2.msra.mxu1 %v499_v59  ;;  %875 = vmatpush2.msra.mxu0 %v501_v60 }
 0x12f   : > { %805 = vmatprep.subr.mxu1 %v492_v61  ;;  %876 = vmatprep.subr.mxu0 %v494_v62 }
 0x130   : > { %806 = vmatpush2.msra.mxu1 %v491_v63  ;;  %877 = vmatpush2.msra.mxu0 %v493_v0 }
 0x131   : > { %807 = vmatprep.subr.mxu1 %v484_v1  ;;  %878 = vmatprep.subr.mxu0 %v486_v2 }
 0x132   : > { %808 = vmatpush2.msra.mxu1 %v483_v3  ;;  %879 = vmatpush2.msra.mxu0 %v485_v4 }
 0x133   : > { %809 = vmatprep.subr.mxu1 %v476_v5  ;;  %880 = vmatprep.subr.mxu0 %v478_v6 }
 0x134   : > { %810 = vmatpush2.msra.mxu1 %v475_v7  ;;  %881 = vmatpush2.msra.mxu0 %v477_v9 }
 0x135   : > { %812 = vmatmul.mubr.f32.vlgmr.msra.gmra.mxu1 %v1346_v8  ;;  %883 = vmatmul.mubr.f32.vlgmr.msra.gmra.mxu0 %v1346_v8 }
 0x1b4   : > { %v671_v11 = vpop.f32.mrf.mxu1  ;;  %v742_v12 = vpop.f32.mrf.mxu0 }
 0x1b5   : > { %v672_v13 = vadd.f32 %v671_v11, %v603_v10  ;;  %v743_v14 = vadd.f32 %v742_v12, %v603_v10 }
 0x1b6   : > { %v673_v15 = vpop.f32.mrf.mxu1  ;;  %v744_v16 = vpop.f32.mrf.mxu0 }
 0x1b7   : > { %889 = vst [vmem:[%s245_s7] sm:$0xff] %v672_v13  ;;  %891 = vst [vmem:[%s245_s7 + $0x10] sm:$0xff] %v743_v14  ;;  %v674_v17 = vadd.f32 %v673_v15, %v603_v10  ;;  %v745_v18 = vadd.f32 %v744_v16, %v603_v10 }
 0x1b9   : > { %890 = vst [vmem:[%s245_s7 + $0x8] sm:$0xff] %v674_v17  ;;  %892 = vst [vmem:[%s245_s7 + $0x18] sm:$0xff] %v745_v18 }
 0x1f5   : > { %v813_v19 = vpop.f32.mrf.mxu1  ;;  %v884_v8 = vpop.f32.mrf.mxu0 }
 0x1f6   : > { %v814_v20 = vadd.f32 %v813_v19, %v603_v10  ;;  %v885_v21 = vadd.f32 %v884_v8, %v603_v10 }
 0x1f7   : > { %v815_v22 = vpop.f32.mrf.mxu1  ;;  %v886_v23 = vpop.f32.mrf.mxu0 }
 0x1f8   : > { %893 = vst [vmem:[%s245_s7 + $0x20] sm:$0xff] %v814_v20  ;;  %895 = vst [vmem:[%s245_s7 + $0x30] sm:$0xff] %v885_v21  ;;  %v816_v24 = vadd.f32 %v815_v22, %v603_v10  ;;  %v887_v25 = vadd.f32 %v886_v23, %v603_v10 }
 0x1fa   : > { %894 = vst [vmem:[%s245_s7 + $0x28] sm:$0xff] %v816_v24  ;;  %896 = vst [vmem:[%s245_s7 + $0x38] sm:$0xff] %v887_v25 }
 0x1fb   : > { %1159 = shalt.err (!%p1156_p3)
}
 0x1fc   : > { %s1160_s24 = scalar_lea.hbm %s1359_s12, 1024  ;;  %s1164_s30 = scalar_lea.hbm %s1405_s4, 2048 }
 0x1fd   : > { %p1161_p5 = scmp.ne.s32.totalorder %s1359_s12, %s1160_s24  ;;  %p1165_p9 = scmp.lt.s32.totalorder %s1359_s12, %s1405_s4 }
 0x1fe   : > { %p1166_p12 = scmp.lt.s32.totalorder %s1164_s30, %s1160_s24 }
 0x1ff   : > { %p1162_p6 = pnand %p1161_p5, %p1299_p4 }
 0x200   : > { %p1167_p10 = por %p1166_p12, %p1165_p9 }
 0x201   : > { %p1163_p7 = pneg %p1162_p6 }
 0x203   : > { %p1168_p11 = pnand %p1167_p10, %p1163_p7 }
 0x205   : > { %1171 = shalt.err (!%p1168_p11)
}
 0x206   : > { %1052 = dma.vmem_to_hbm [thread:$0]  (%p1299_p4), %s915_s9, 1024, %s1359_s12, %s898_s18  }
 0x207 PF: > { %p1064_p13 = scmp.ge.s32.totalorder %s1226_s20, 2  ;;  %s926_s7 = sand.u32 1, %s1206_s15  }
 0x208   : > { %s927_s8 = scalar_lea.sflag [#allocation4], %s926_s7 }
 0x209   : > { %p1059_p0 = pnand %p1064_p13, %p1306_p8 }
 0x20b   : > { %p1060_p1 = pneg %p1059_p0 }
 0x20d   : > { %1201 = dma.done.wait (%p1060_p1), %s927_s8, 1024  }
 0x20e   : > { %1203 = vsyncadd (%p1060_p1), %s927_s8, 4294966272  ;;  %s18_s20 = sadd.s32 1, %s1226_s20   ;;  %s1410_s15 = smov %s1210_s16 }
 0x20f   : > { %p15_p2 = scmp.ge.s32.totalorder %s18_s20, 4   ;;  %s1411_s16 = smov %s1214_s17 }
 0x210   : > { %s1412_s17 = smov %s1312_s28  ;;  %s1413_s18 = smov %s1222_s19 }
 0x211   : > { %s1414_s19 = smov %s1416_s23  ;;  %17 = sbr.rel (!%p15_p2) target bundleno = 5 (0x5), region = 82 }
 0x216   :  { %932 = vsyncpa [#allocation3], 1 }
 0x217   :  { %934 = vsyncpa [#allocation3 + $0x1], 1 }
 0x218   :  { %935 = vsyncpa [#allocation4], 1 }
 0x219   :  { %937 = vsyncpa [#allocation4 + $0x1], 1 }

</bundles_post_ra>
